<compile_context>
chip_gen: v7x
topology: tpu7x:2x2x1
jax: 0.10.0
libtpu: 0.0.40
codegen_flags: <defaults>
</compile_context>

<pallas_src>
import math
import numpy as np
import jax
import jax.numpy as jnp
from jax.experimental import pallas as pl
from jax.experimental.pallas import tpu as pltpu


_SQRT_2_OVER_PI = math.sqrt(2.0 / math.pi)


def _gelu_tanh(x):
    # tanh-form GELU: one EUP tanh + a handful of VALU ops.
    # |err| vs exact erf-GELU <= ~3e-3; covered by the test tolerance.
    return 0.5 * x * (1.0 + jnp.tanh(_SQRT_2_OVER_PI * (x + 0.044715 * x * x * x)))


# ----------------------------------- kernel ---------------------------------------

def linear_fm_head_kernel(
    lin_ref,    # (TB, F)  f32   gathered linear-embedding values (scalar bias folded in)
    emb_ref,    # (TB, E)  f32   flattened field embeddings, E = F*H
    s_ref,      # (E, H)   f32   0/1 block-sum matrix: embf @ S == sum over fields
    w1a_ref,    # (E, E)   bf16  Mlp1.fc1 weight
    b1a_ref,    # (1, E)   f32   Mlp1.fc1 bias
    w12_ref,    # (E, H)   bf16  fused (Mlp1.fc2 @ Mlp2.fc1)
    b12_ref,    # (1, H)   f32   fused bias
    w23_ref,    # (1, H)   f32   fused (Mlp2.fc2 @ final Linear), transposed; applied on VPU
    out_ref,    # (TB, 1)  f32
):
    f32 = jnp.float32
    bf16 = jnp.bfloat16

    e = emb_ref[...]                                             # (TB, E) f32

    # --- linear term: sum_f w[x_f + off_f]  (+ scalar bias, folded in the wrapper) ---
    lin = jnp.sum(lin_ref[...], axis=1, keepdims=True)           # (TB, 1)

    # --- FM term via block-sum matmuls (field reduction done on the MXU, f32) ---
    s = s_ref[...]
    sum_f = jnp.dot(e, s, preferred_element_type=f32)            # (TB, H)  = sum_f e
    sum_sq = jnp.dot(e * e, s, preferred_element_type=f32)       # (TB, H)  = sum_f e^2
    fm = 0.5 * jnp.sum(sum_f * sum_f - sum_sq, axis=1, keepdims=True)   # (TB, 1)

    # --- deep MLP: 2 bf16 matmuls (f32 accumulate) + VPU final projection ---
    h = jnp.dot(e.astype(bf16), w1a_ref[...], preferred_element_type=f32) + b1a_ref[...]
    h = _gelu_tanh(h)                                            # (TB, E) f32
    h = jnp.dot(h.astype(bf16), w12_ref[...], preferred_element_type=f32) + b12_ref[...]
    h = _gelu_tanh(h)                                            # (TB, H) f32
    mlp = jnp.sum(h * w23_ref[...], axis=1, keepdims=True)       # (TB, 1) VPU mul + reduce

    out_ref[...] = jax.nn.sigmoid(lin + fm + mlp)


# ---------------------------------- wrapper ----------------------------------------

def _fused_kernel_params(params, F, H):
    """Fold the linear/linear pairs, build the block-sum matrix, cast MXU operands."""
    f32 = jnp.float32
    w12 = params["w1b"] @ params["w2a"]                      # (E, H)
    b12 = params["b1b"] @ params["w2a"] + params["b2a"]      # (1, H)
    w23 = params["w2b"] @ params["w3"]                       # (H, 1)
    b23 = params["b2b"] @ params["w3"] + params["b3"]        # (1, 1)
    # 0/1 block-sum matrix: embf (B, F*H) @ S (F*H, H) == sum over the F fields.
    s = jnp.tile(jnp.eye(H, dtype=f32), (F, 1))              # (E, H)
    return {
        "w1a": params["w1a"].astype(jnp.bfloat16),
        "b1a": params["b1a"].astype(f32),
        "w12": w12.astype(jnp.bfloat16),
        "b12": b12.astype(f32),
        "w23": jnp.transpose(w23).astype(f32),               # (1, H)
        "scalar_bias": (params["bias"] + b23).astype(f32),   # (1, 1)
        "s": s,
    }


def linear_fm_head(x, embeddings, params):
    """x: (B, F) int32; embeddings: (B, F, H) float32. Returns (B,) float32."""
    B, F = x.shape
    H = embeddings.shape[-1]
    E = F * H

    kp = _fused_kernel_params(params, F, H)

    # Embedding-table gather for the linear term (plain-JAX glue).
    idx = x + params["offsets"][None, :]                          # (B, F)
    lin_vals = jnp.take(params["emb_w"][:, 0], idx, axis=0)       # (B, F) f32
    # Fold the combined scalar bias (linear bias + fused B23) into column 0, so the
    # in-kernel field sum yields the biased linear term; removes two (1,1) inputs.
    lin_vals = lin_vals.at[:, 0].add(kp["scalar_bias"][0, 0])

    emb_flat = embeddings.reshape(B, E).astype(jnp.float32)       # (B, E)

    # Batch tiling: TB is a multiple of 8 (sublane), big tiles amortize per-step
    # overhead and keep the MXU M-dimension full. Tail is zero-padded and sliced off.
    TB = 512 if B >= 512 else int(-(-B // 8) * 8)
    n_tiles = int(-(-B // TB))
    B_pad = n_tiles * TB
    if B_pad != B:
        pad = ((0, B_pad - B), (0, 0))
        lin_vals = jnp.pad(lin_vals, pad)
        emb_flat = jnp.pad(emb_flat, pad)

    batch2 = lambda i: (i, 0)
    const2 = lambda i: (0, 0)

    out = pl.pallas_call(
        linear_fm_head_kernel,
        out_shape=jax.ShapeDtypeStruct((B_pad, 1), jnp.float32),
        grid=(n_tiles,),
        in_specs=[
            pl.BlockSpec((TB, F), batch2),     # lin_vals
            pl.BlockSpec((TB, E), batch2),     # flattened embeddings
            pl.BlockSpec((E, H), const2),      # block-sum matrix S (stays resident)
            pl.BlockSpec((E, E), const2),      # w1a (bf16)
            pl.BlockSpec((1, E), const2),      # b1a
            pl.BlockSpec((E, H), const2),      # w12 (bf16, fused)
            pl.BlockSpec((1, H), const2),      # b12 (fused)
            pl.BlockSpec((1, H), const2),      # w23 (fused, transposed)
        ],
        out_specs=pl.BlockSpec((TB, 1), batch2),
        compiler_params=pltpu.CompilerParams(dimension_semantics=("parallel",)),
    )(
        lin_vals, emb_flat, kp["s"],
        kp["w1a"], kp["b1a"], kp["w12"], kp["b12"], kp["w23"],
    )
    return out[:B, 0]  # == .squeeze(1)


# ----------------------------- deterministic params --------------------------------

def init_params(key, in_features, hidden_features):
    F = len(in_features)
    H = hidden_features
    E = F * H
    V = int(sum(in_features))
    keys = jax.random.split(key, 6)

    def linear_init(k, fan_in, fan_out):
        kw, kb = jax.random.split(k)
        lim = 1.0 / math.sqrt(fan_in)
        w = jax.random.uniform(kw, (fan_in, fan_out), jnp.float32, -lim, lim)
        b = jax.random.uniform(kb, (1, fan_out), jnp.float32, -lim, lim)
        return w, b

    params = {
        # nn.Embedding default init ~ N(0, 1)
        "emb_w": jax.random.normal(keys[0], (V, 1), jnp.float32),
        # LinearFeatureEmbedding.bias is initialized to zeros in __init__
        "bias": jnp.zeros((1, 1), jnp.float32),
        "offsets": jnp.asarray(
            np.array((0, *np.cumsum(in_features)[:-1]), dtype=np.int32)
        ),
    }
    params["w1a"], params["b1a"] = linear_init(keys[1], E, E)   # Mlp1.fc1 (E -> E)
    params["w1b"], params["b1b"] = linear_init(keys[2], E, H)   # Mlp1.fc2 (E -> H)
    params["w2a"], params["b2a"] = linear_init(keys[3], H, H)   # Mlp2.fc1 (H -> H)
    params["w2b"], params["b2b"] = linear_init(keys[4], H, H)   # Mlp2.fc2 (H -> H)
    params["w3"], params["b3"] = linear_init(keys[5], H, 1)     # final Linear
    return params


# ----------------------------- pure-JAX reference ----------------------------------

def reference(x, embeddings, params):
    """Exact f32 reference matching the PyTorch module (erf GELU, unfused)."""
    B, F = x.shape
    H = embeddings.shape[-1]
    E = F * H
    idx = x + params["offsets"][None, :]
    lin = jnp.sum(jnp.take(params["emb_w"][:, 0], idx, axis=0), axis=1, keepdims=True)
    lin = lin + params["bias"]
    sos = jnp.sum(embeddings, axis=1) ** 2
    ssq = jnp.sum(embeddings ** 2, axis=1)
    fm = 0.5 * jnp.sum(sos - ssq, axis=1, keepdims=True)

    def gelu_exact(v):
        return 0.5 * v * (1.0 + jax.scipy.special.erf(v / math.sqrt(2.0)))

    h = embeddings.reshape(B, E)
    h = gelu_exact(h @ params["w1a"] + params["b1a"])
    h = h @ params["w1b"] + params["b1b"]
    h = gelu_exact(h @ params["w2a"] + params["b2a"])
    h = h @ params["w2b"] + params["b2b"]
    mlp = h @ params["w3"] + params["b3"]
    return jax.nn.sigmoid((lin + fm + mlp)[:, 0])


# ------------------------------------- main -----------------------------------------

if __name__ == "__main__":
    in_features = [10, 7, 5, 12]   # 4 categorical fields
    hidden = 16                    # hidden_features == embedding dim per field
    B = 8
    F = len(in_features)

    key = jax.random.PRNGKey(0)
    kx, ke, kp = jax.random.split(key, 3)

    # per-field categorical indices in [0, cardinality)
    x = jnp.stack(
        [jax.random.randint(jax.random.fold_in(kx, i), (B,), 0, n, dtype=jnp.int32)
         for i, n in enumerate(in_features)],
        axis=1,
    )                                                                # (B, F) int32
    embeddings = jax.random.normal(ke, (B, F, hidden), jnp.float32)  # (B, F, H)

    params = init_params(kp, in_features, hidden)

    out = linear_fm_head(x, embeddings, params)
    out = jax.block_until_ready(out)

    ref = reference(x, embeddings, params)
    # bf16 matmul operands + tanh-form GELU vs exact f32/erf reference -> ~1e-2 tol.
    np.testing.assert_allclose(np.asarray(out), np.asarray(ref), rtol=2e-2, atol=2e-2)

    print("KERNEL_OK")
</pallas_src>

<mosaic_0001>
module attributes {stable_mosaic.version = 11 : i64} {
  func.func @linear_fm_head_kernel(%arg0: i32, %arg1: memref<8x4xf32, #tpu.memory_space<vmem>>, %arg2: memref<8x64xf32, #tpu.memory_space<vmem>>, %arg3: memref<64x16xf32, #tpu.memory_space<vmem>>, %arg4: memref<64x64xbf16, #tpu.memory_space<vmem>>, %arg5: memref<1x64xf32, #tpu.memory_space<vmem>>, %arg6: memref<64x16xbf16, #tpu.memory_space<vmem>>, %arg7: memref<1x16xf32, #tpu.memory_space<vmem>>, %arg8: memref<1x16xf32, #tpu.memory_space<vmem>>, %arg9: memref<8x1xf32, #tpu.memory_space<vmem>>) attributes {dimension_semantics = [#tpu.dimension_semantics<parallel>], iteration_bounds = array<i64: 1>, scalar_prefetch = 0 : i64, scratch_operands = 0 : i64, tpu.core_type = #tpu.core_type<tc>, window_params = [{transform_indices = @transform_0, window_bounds = array<i64: 8, 4>}, {transform_indices = @transform_1, window_bounds = array<i64: 8, 64>}, {pipeline_mode = #tpu.pipeline_mode<synchronous>, transform_indices = @transform_2, window_bounds = array<i64: 64, 16>}, {pipeline_mode = #tpu.pipeline_mode<synchronous>, transform_indices = @transform_3, window_bounds = array<i64: 64, 64>}, {pipeline_mode = #tpu.pipeline_mode<synchronous>, transform_indices = @transform_4, window_bounds = array<i64: 1, 64>}, {pipeline_mode = #tpu.pipeline_mode<synchronous>, transform_indices = @transform_5, window_bounds = array<i64: 64, 16>}, {pipeline_mode = #tpu.pipeline_mode<synchronous>, transform_indices = @transform_6, window_bounds = array<i64: 1, 16>}, {pipeline_mode = #tpu.pipeline_mode<synchronous>, transform_indices = @transform_7, window_bounds = array<i64: 1, 16>}, {transform_indices = @transform_8, window_bounds = array<i64: 8, 1>}]} {
    %c0 = arith.constant 0 : index
    %c0_0 = arith.constant 0 : index
    %0 = vector.load %arg2[%c0, %c0_0] : memref<8x64xf32, #tpu.memory_space<vmem>>, vector<8x64xf32>
    %c0_1 = arith.constant 0 : index
    %c0_2 = arith.constant 0 : index
    %1 = vector.load %arg1[%c0_1, %c0_2] : memref<8x4xf32, #tpu.memory_space<vmem>>, vector<8x4xf32>
    %cst = arith.constant dense<0.000000e+00> : vector<8xf32>
    %2 = vector.multi_reduction <add>, %1, %cst [1] : vector<8x4xf32> to vector<8xf32>
    %3 = vector.shape_cast %2 : vector<8xf32> to vector<8x1xf32>
    %c0_3 = arith.constant 0 : index
    %c0_4 = arith.constant 0 : index
    %4 = vector.load %arg3[%c0_3, %c0_4] : memref<64x16xf32, #tpu.memory_space<vmem>>, vector<64x16xf32>
    %cst_5 = arith.constant dense<0.000000e+00> : vector<8x16xf32>
    %5 = tpu.matmul %0, %4, %cst_5 {dimension_numbers = #tpu.dot_dimension_numbers<[1], [0], [0], [1], [0, 0, 1, 1], [], []>} : vector<8x64xf32>, vector<64x16xf32>, vector<8x16xf32> -> vector<8x16xf32>
    %6 = arith.mulf %0, %0 : vector<8x64xf32>
    %cst_6 = arith.constant dense<0.000000e+00> : vector<8x16xf32>
    %7 = tpu.matmul %6, %4, %cst_6 {dimension_numbers = #tpu.dot_dimension_numbers<[1], [0], [0], [1], [0, 0, 1, 1], [], []>} : vector<8x64xf32>, vector<64x16xf32>, vector<8x16xf32> -> vector<8x16xf32>
    %8 = arith.mulf %5, %5 : vector<8x16xf32>
    %9 = arith.subf %8, %7 : vector<8x16xf32>
    %cst_7 = arith.constant dense<0.000000e+00> : vector<8xf32>
    %10 = vector.multi_reduction <add>, %9, %cst_7 [1] : vector<8x16xf32> to vector<8xf32>
    %11 = vector.shape_cast %10 : vector<8xf32> to vector<8x1xf32>
    %cst_8 = arith.constant 5.000000e-01 : f32
    %12 = vector.broadcast %cst_8 : f32 to vector<8x1xf32>
    %13 = arith.mulf %12, %11 : vector<8x1xf32>
    %14 = arith.truncf %0 : vector<8x64xf32> to vector<8x64xbf16>
    %c0_9 = arith.constant 0 : index
    %c0_10 = arith.constant 0 : index
    %15 = vector.load %arg4[%c0_9, %c0_10] : memref<64x64xbf16, #tpu.memory_space<vmem>>, vector<64x64xbf16>
    %cst_11 = arith.constant dense<0.000000e+00> : vector<8x64xf32>
    %16 = tpu.matmul %14, %15, %cst_11 {dimension_numbers = #tpu.dot_dimension_numbers<[1], [0], [0], [1], [0, 0, 1, 1], [], []>} : vector<8x64xbf16>, vector<64x64xbf16>, vector<8x64xf32> -> vector<8x64xf32>
    %c0_12 = arith.constant 0 : index
    %c0_13 = arith.constant 0 : index
    %17 = vector.load %arg5[%c0_12, %c0_13] : memref<1x64xf32, #tpu.memory_space<vmem>>, vector<1x64xf32>
    %18 = vector.broadcast %17 : vector<1x64xf32> to vector<8x64xf32>
    %19 = arith.addf %16, %18 : vector<8x64xf32>
    %cst_14 = arith.constant 5.000000e-01 : f32
    %20 = vector.broadcast %cst_14 : f32 to vector<8x64xf32>
    %21 = arith.mulf %20, %19 : vector<8x64xf32>
    %cst_15 = arith.constant 4.471500e-02 : f32
    %22 = vector.broadcast %cst_15 : f32 to vector<8x64xf32>
    %23 = arith.mulf %22, %19 : vector<8x64xf32>
    %24 = arith.mulf %23, %19 : vector<8x64xf32>
    %25 = arith.mulf %24, %19 : vector<8x64xf32>
    %26 = arith.addf %19, %25 : vector<8x64xf32>
    %cst_16 = arith.constant 0.797884583 : f32
    %27 = vector.broadcast %cst_16 : f32 to vector<8x64xf32>
    %28 = arith.mulf %27, %26 : vector<8x64xf32>
    %29 = math.tanh %28 : vector<8x64xf32>
    %cst_17 = arith.constant 1.000000e+00 : f32
    %30 = vector.broadcast %cst_17 : f32 to vector<8x64xf32>
    %31 = arith.addf %30, %29 : vector<8x64xf32>
    %32 = arith.mulf %21, %31 : vector<8x64xf32>
    %33 = arith.truncf %32 : vector<8x64xf32> to vector<8x64xbf16>
    %c0_18 = arith.constant 0 : index
    %c0_19 = arith.constant 0 : index
    %34 = vector.load %arg6[%c0_18, %c0_19] : memref<64x16xbf16, #tpu.memory_space<vmem>>, vector<64x16xbf16>
    %cst_20 = arith.constant dense<0.000000e+00> : vector<8x16xf32>
    %35 = tpu.matmul %33, %34, %cst_20 {dimension_numbers = #tpu.dot_dimension_numbers<[1], [0], [0], [1], [0, 0, 1, 1], [], []>} : vector<8x64xbf16>, vector<64x16xbf16>, vector<8x16xf32> -> vector<8x16xf32>
    %c0_21 = arith.constant 0 : index
    %c0_22 = arith.constant 0 : index
    %36 = vector.load %arg7[%c0_21, %c0_22] : memref<1x16xf32, #tpu.memory_space<vmem>>, vector<1x16xf32>
    %37 = vector.broadcast %36 : vector<1x16xf32> to vector<8x16xf32>
    %38 = arith.addf %35, %37 : vector<8x16xf32>
    %cst_23 = arith.constant 5.000000e-01 : f32
    %39 = vector.broadcast %cst_23 : f32 to vector<8x16xf32>
    %40 = arith.mulf %39, %38 : vector<8x16xf32>
    %cst_24 = arith.constant 4.471500e-02 : f32
    %41 = vector.broadcast %cst_24 : f32 to vector<8x16xf32>
    %42 = arith.mulf %41, %38 : vector<8x16xf32>
    %43 = arith.mulf %42, %38 : vector<8x16xf32>
    %44 = arith.mulf %43, %38 : vector<8x16xf32>
    %45 = arith.addf %38, %44 : vector<8x16xf32>
    %cst_25 = arith.constant 0.797884583 : f32
    %46 = vector.broadcast %cst_25 : f32 to vector<8x16xf32>
    %47 = arith.mulf %46, %45 : vector<8x16xf32>
    %48 = math.tanh %47 : vector<8x16xf32>
    %cst_26 = arith.constant 1.000000e+00 : f32
    %49 = vector.broadcast %cst_26 : f32 to vector<8x16xf32>
    %50 = arith.addf %49, %48 : vector<8x16xf32>
    %51 = arith.mulf %40, %50 : vector<8x16xf32>
    %c0_27 = arith.constant 0 : index
    %c0_28 = arith.constant 0 : index
    %52 = vector.load %arg8[%c0_27, %c0_28] : memref<1x16xf32, #tpu.memory_space<vmem>>, vector<1x16xf32>
    %53 = vector.broadcast %52 : vector<1x16xf32> to vector<8x16xf32>
    %54 = arith.mulf %51, %53 : vector<8x16xf32>
    %cst_29 = arith.constant dense<0.000000e+00> : vector<8xf32>
    %55 = vector.multi_reduction <add>, %54, %cst_29 [1] : vector<8x16xf32> to vector<8xf32>
    %56 = vector.shape_cast %55 : vector<8xf32> to vector<8x1xf32>
    %57 = arith.addf %3, %13 : vector<8x1xf32>
    %58 = arith.addf %57, %56 : vector<8x1xf32>
    %59 = arith.negf %58 : vector<8x1xf32>
    %60 = math.exp %59 : vector<8x1xf32>
    %cst_30 = arith.constant 1.000000e+00 : f32
    %61 = vector.broadcast %cst_30 : f32 to vector<8x1xf32>
    %62 = arith.addf %61, %60 : vector<8x1xf32>
    %63 = arith.divf %61, %62 : vector<8x1xf32>
    %c0_31 = arith.constant 0 : index
    %c0_32 = arith.constant 0 : index
    %64 = vector.load %arg9[%c0_31, %c0_32] : memref<8x1xf32, #tpu.memory_space<vmem>>, vector<8x1xf32>
    tpu.vector_store %arg9[%c0_31, %c0_32], %63 {strides = array<i32>} : memref<8x1xf32, #tpu.memory_space<vmem>>, vector<8x1xf32>,
    return
  }
  func.func @transform_0(%arg0: i32) -> (i32, i32) {
    %c0_i32 = arith.constant 0 : i32
    %c0_i32_0 = arith.constant 0 : i32
    return %arg0, %c0_i32 : i32, i32
  }
  func.func @transform_1(%arg0: i32) -> (i32, i32) {
    %c0_i32 = arith.constant 0 : i32
    %c0_i32_0 = arith.constant 0 : i32
    return %arg0, %c0_i32 : i32, i32
  }
  func.func @transform_2(%arg0: i32) -> (i32, i32) {
    %c0_i32 = arith.constant 0 : i32
    %c0_i32_0 = arith.constant 0 : i32
    %c0_i32_1 = arith.constant 0 : i32
    return %c0_i32, %c0_i32_0 : i32, i32
  }
  func.func @transform_3(%arg0: i32) -> (i32, i32) {
    %c0_i32 = arith.constant 0 : i32
    %c0_i32_0 = arith.constant 0 : i32
    %c0_i32_1 = arith.constant 0 : i32
    return %c0_i32, %c0_i32_0 : i32, i32
  }
  func.func @transform_4(%arg0: i32) -> (i32, i32) {
    %c0_i32 = arith.constant 0 : i32
    %c0_i32_0 = arith.constant 0 : i32
    %c0_i32_1 = arith.constant 0 : i32
    return %c0_i32, %c0_i32_0 : i32, i32
  }
  func.func @transform_5(%arg0: i32) -> (i32, i32) {
    %c0_i32 = arith.constant 0 : i32
    %c0_i32_0 = arith.constant 0 : i32
    %c0_i32_1 = arith.constant 0 : i32
    return %c0_i32, %c0_i32_0 : i32, i32
  }
  func.func @transform_6(%arg0: i32) -> (i32, i32) {
    %c0_i32 = arith.constant 0 : i32
    %c0_i32_0 = arith.constant 0 : i32
    %c0_i32_1 = arith.constant 0 : i32
    return %c0_i32, %c0_i32_0 : i32, i32
  }
  func.func @transform_7(%arg0: i32) -> (i32, i32) {
    %c0_i32 = arith.constant 0 : i32
    %c0_i32_0 = arith.constant 0 : i32
    %c0_i32_1 = arith.constant 0 : i32
    return %c0_i32, %c0_i32_0 : i32, i32
  }
  func.func @transform_8(%arg0: i32) -> (i32, i32) {
    %c0_i32 = arith.constant 0 : i32
    %c0_i32_0 = arith.constant 0 : i32
    return %arg0, %c0_i32 : i32, i32
  }
}

</mosaic_0001>

<bundles_post_ra>
// kernel: tpu_custom_call.1
= control target key start
LH: loop header
LB: loop body
LE: loop exit
PB: predicated region body
PF: predicated region fallthrough
CT: control target
= control target key end

     0   :  { %v557_v0 = vmov 0.0|0.0   ;;  %vm558_vm0 = vmmov 0   ;;  %v559_v6 = vmov 0.0   ;;  %vm44_vm1 = vcmask 523264   ;;  %s681_s2 = inlined_call_operand.vmem [shape: f32[64,16], index: 2, kind: input, shape index: {}]   ;;  %s682_s3 = inlined_call_operand.vmem [shape: bf16[64,64], index: 3, kind: input, shape index: {}]   ;;  %s683_s1 = inlined_call_operand.vmem [shape: f32[8,64], index: 1, kind: input, shape index: {}]   ;;  %s684_s5 = inlined_call_operand.vmem [shape: bf16[64,16], index: 5, kind: input, shape index: {}]   ;;  %s685_s0 = inlined_call_operand.vmem [shape: f32[8,4], index: 0, kind: input, shape index: {}]   ;;  %s686_s4 = inlined_call_operand.vmem [shape: f32[1,64], index: 4, kind: input, shape index: {}]   ;;  %s687_s6 = inlined_call_operand.vmem [shape: f32[1,16], index: 6, kind: input, shape index: {}]   ;;  %s688_s7 = inlined_call_operand.vmem [shape: f32[1,16], index: 7, kind: input, shape index: {}]   ;;  %s689_s8 = inlined_call_operand.vmem [shape: f32[8,1], index: 8, kind: output, shape index: {}]  }
   0x1   :  { %514 = vmatprep.subr.bf16.mxu0 %v557_v0  ;;  %v36_v1 = vld [vmem:[%s681_s2] sm:$0xff]  ;;  %v37_v2 = vld [vmem:[%s681_s2 + $0x8] sm:$0xff]  ;;  %526 = vmatprep.subr.bf16.mxu1 %v557_v0  ;;  %v38_v3 = vld [vmem:[%s681_s2 + $0x10] sm:$0xff]  ;;  %vm194_vm2 = vcmask 130048   ;;  %vm32_vm3 = vcmask 31744   ;;  %vm402_vm4 = vcmask 7168  }
   0x2   :  { %v515_v4 = vpack.c.bf16 %v37_v2, %v36_v1  ;;  %v39_v5 = vld [vmem:[%s681_s2 + $0x18] sm:$0xff]  ;;  %468 = vmatprep.mubr.msk.f32.mxu0 %vm558_vm0, %v559_v6  ;;  %487 = vmatprep.mubr.msk.f32.mxu1 %vm558_vm0, %v559_v6  ;;  %v40_v8 = vld [vmem:[%s681_s2 + $0x20] sm:$0xff]  ;;  %v41_v9 = vld [vmem:[%s681_s2 + $0x28] sm:$0xff] }
   0x3   :  { %v518_v7 = vpack.c.bf16 %v39_v5, %v38_v3  ;;  %v521_v10 = vpack.c.bf16 %v41_v9, %v40_v8  ;;  %v42_v11 = vld [vmem:[%s681_s2 + $0x30] sm:$0xff]  ;;  %v43_v12 = vld [vmem:[%s681_s2 + $0x38] sm:$0xff]  ;;  %v30_v14 = vld [vmem:[%s683_s1] sm:$0xff] }
   0x4   :  { %516 = vmatpush3.bf16.msra.mxu0 %v515_v4  ;;  %528 = vmatpush3.bf16.msra.mxu1 %v515_v4  ;;  %v524_v13 = vpack.c.bf16 %v43_v12, %v42_v11  ;;  %v118_v15 = vmul.f32 %v30_v14, %v30_v14  ;;  %v541_v16 = vld [vmem:[%s682_s3] sm:$0xff]   ;;  %v542_v17 = vld [vmem:[%s682_s3 + $0x8] sm:$0xff]   ;;  %v543_v18 = vld [vmem:[%s682_s3 + $0x10] sm:$0xff]   ;;  %v199_v20 = vpack.c.bf16 %v30_v14, %v30_v14 }
   0x5   :  { %517 = vmatprep.subr.bf16.mxu0 %v557_v0  ;;  %529 = vmatprep.subr.bf16.mxu1 %v557_v0  ;;  %v544_v19 = vld [vmem:[%s682_s3 + $0x18] sm:$0xff]   ;;  %v545_v21 = vld [vmem:[%s684_s5] sm:$0xff]   ;;  %v546_v22 = vld [vmem:[%s684_s5 + $0x8] sm:$0xff]  }
   0x6   :  { %v547_v23 = vld [vmem:[%s684_s5 + $0x10] sm:$0xff]   ;;  %v548_v24 = vld [vmem:[%s684_s5 + $0x18] sm:$0xff]   ;;  %v31_v31 = vld [vmem:[%s685_s0] sm:$0xff] }
   0x7   :  { %v33_v33 = vsel %vm32_vm3, %v31_v31, 0.0  ;;  %v410_v34 = vld [vmem:[%s686_s4] ss:$0 sm:$0xff] }
   0x8   :  { %519 = vmatpush3.bf16.msra.mxu0 %v518_v7  ;;  %531 = vmatpush3.bf16.msra.mxu1 %v518_v7  ;;  %v416_v50 = vld [vmem:[%s687_s6] ss:$0 sm:$0xff] }
   0x9   :  { %520 = vmatprep.subr.bf16.mxu0 %v557_v0  ;;  %532 = vmatprep.subr.bf16.mxu1 %v557_v0 }
   0xc   :  { %522 = vmatpush3.bf16.msra.mxu0 %v521_v10  ;;  %534 = vmatpush3.bf16.msra.mxu1 %v521_v10 }
   0xd   :  { %523 = vmatprep.subr.bf16.mxu0 %v557_v0  ;;  %535 = vmatprep.subr.bf16.mxu1 %v557_v0  ;;  %v422_v0 = vld [vmem:[%s688_s7] ss:$0 sm:$0xff] }
  0x10   :  { %525 = vmatpush3.bf16.msra.mxu0 %v524_v13  ;;  %537 = vmatpush3.bf16.msra.mxu1 %v524_v13 }
  0x11   :  { %490 = vmatprep.subr.bf16.mxu0 %v559_v6  ;;  %502 = vmatprep.subr.bf16.mxu1 %v559_v6 }
  0x13   :  { %469 = vmatmul.mubr.msk.f32.vlgmr.msra.gmra.mrb[0].mxu0 %vm44_vm1, %v30_v14  ;;  %488 = vmatmul.mubr.msk.f32.vlgmr.msra.gmra.mrb[0].mxu1 %vm44_vm1, %v118_v15 }
  0x14   :  { %491 = vmatpush3.bf16.msra.mxu0 %v541_v16  ;;  %498 = vmatprep.mubr.msk.bf16.mxu0 %vm558_vm0, %v559_v6 }
  0x15   :  { %492 = vmatprep.subr.bf16.mxu0 %v559_v6  ;;  %510 = vmatprep.mubr.msk.bf16.mxu1 %vm558_vm0, %v559_v6 }
  0x16   :  { %503 = vmatpush3.bf16.msra.mxu1 %v545_v21 }
  0x17   :  { %504 = vmatprep.subr.bf16.mxu1 %v559_v6 }
  0x18   :  { %493 = vmatpush3.bf16.msra.mxu0 %v542_v17 }
  0x19   :  { %494 = vmatprep.subr.bf16.mxu0 %v559_v6 }
  0x1a   :  { %505 = vmatpush3.bf16.msra.mxu1 %v546_v22 }
  0x1b   :  { %506 = vmatprep.subr.bf16.mxu1 %v559_v6 }
  0x1c   :  { %495 = vmatpush3.bf16.msra.mxu0 %v543_v18 }
  0x1d   :  { %496 = vmatprep.subr.bf16.mxu0 %v559_v6 }
  0x1e   :  { %507 = vmatpush3.bf16.msra.mxu1 %v547_v23 }
  0x1f   :  { %508 = vmatprep.subr.bf16.mxu1 %v559_v6 }
  0x20   :  { %497 = vmatpush3.bf16.msra.mxu0 %v544_v19 }
  0x22   :  { %509 = vmatpush3.bf16.msra.mxu1 %v548_v24 }
  0x23   :  { %499 = vmatmul.mubr.msk.bf16.vlgmr.msra.gmra.mrb[4].mxu0 %vm44_vm1, %v199_v20 }
  0xe6   :  { %v114_v25 = vpop.f32.mrb[0].mxu0  ;;  %v188_v26 = vpop.f32.mrb[0].mxu1 }
  0xe7   :  { %v192_v27 = vmul.f32 %v114_v25, %v114_v25  ;;  %v470_v28 = vpop.f32.mrb[1].mxu0  ;;  %v489_v29 = vpop.f32.mrb[1].mxu1 }
  0xe9   :  { %v193_v30 = vsub.f32 %v192_v27, %v188_v26 }
  0xeb   :  { %v195_v32 = vsel %vm194_vm2, %v193_v30, 0.0 }
  0xec   :  { %196 = vadd.xlane.f32.xlu0 %v195_v32 }
  0xf0   :  { %34 = vadd.xlane.f32.xlu0 %v33_v33 }
  0xf6   :  { %v276_v35 = vpop.f32.mrb[4].mxu0 }
  0xf7   :  { %v277_v36 = vadd.f32 %v410_v34, %v276_v35  ;;  %v500_v37 = vpop.f32.mrb[5].mxu0 }
  0xf8   :  { %v279_v38 = vpop.f32.mrb[6].mxu0 }
  0xf9   :  { %v283_v39 = vmul.f32 0.044715, %v277_v36  ;;  %v501_v40 = vpop.f32.mrb[7].mxu0  ;;  %v282_v46 = vmul.f32 0.5, %v277_v36 }
  0xfb   :  { %v284_v41 = vmul.f32 %v283_v39, %v277_v36 }
  0xfd   :  { %v285_v42 = vmul.f32 %v284_v41, %v277_v36 }
  0xff   :  { %v286_v43 = vadd.f32 %v285_v42, %v277_v36 }
 0x101   :  { %v287_v44 = vmul.f32 0.7978846, %v286_v43 }
 0x103   :  { %549 = vtanh.f32 %v287_v44 }
 0x10d   :  { %v550_v45 = vpop.eup %549 }
 0x10e   :  { %v289_v47 = vadd.f32 1.0, %v550_v45 }
 0x110   :  { %v290_v48 = vmul.f32 %v289_v47, %v282_v46 }
 0x112   :  { %v291_v49 = vpack.c.bf16 %v290_v48, %v290_v48 }
 0x114   :  { %511 = vmatmul.mubr.msk.bf16.vlgmr.msra.gmra.mrb[4].mxu1 %vm44_vm1, %v291_v49 }
 0x179   :  { %v197_v4 = vpop.xlane.xlu0 %196 }
 0x17a   :  { %v198_v5 = vmul.f32 0.5, %v197_v4 }
 0x17d   :  { %v35_v6 = vpop.xlane.xlu0 %34 }
 0x17e   :  { %v394_v7 = vadd.f32 %v198_v5, %v35_v6 }
 0x1e7   :  { %v368_v51 = vpop.f32.mrb[4].mxu1 }
 0x1e8   :  { %v369_v52 = vadd.f32 %v416_v50, %v368_v51  ;;  %v512_v53 = vpop.f32.mrb[5].mxu1 }
 0x1e9   :  { %v371_v54 = vpop.f32.mrb[6].mxu1 }
 0x1ea   :  { %v375_v55 = vmul.f32 0.044715, %v369_v52  ;;  %v513_v56 = vpop.f32.mrb[7].mxu1  ;;  %v374_v62 = vmul.f32 0.5, %v369_v52 }
 0x1ec   :  { %v376_v57 = vmul.f32 %v375_v55, %v369_v52 }
 0x1ee   :  { %v377_v58 = vmul.f32 %v376_v57, %v369_v52 }
 0x1f0   :  { %v378_v59 = vadd.f32 %v377_v58, %v369_v52 }
 0x1f2   :  { %v379_v60 = vmul.f32 0.7978846, %v378_v59 }
 0x1f4   :  { %551 = vtanh.f32 %v379_v60 }
 0x1fe   :  { %v552_v61 = vpop.eup %551 }
 0x1ff   :  { %v381_v63 = vadd.f32 1.0, %v552_v61 }
 0x201   :  { %v382_v1 = vmul.f32 %v381_v63, %v374_v62 }
 0x203   :  { %v390_v2 = vmul.f32 %v422_v0, %v382_v1 }
 0x205   :  { %v391_v3 = vsel %vm194_vm2, %v390_v2, 0.0 }
 0x206   :  { %392 = vadd.xlane.f32.xlu1 %v391_v3 }
 0x293   :  { %v393_v8 = vpop.xlane.xlu1 %392 }
 0x294   :  { %v395_v9 = vadd.f32 %v394_v7, %v393_v8 }
 0x296   :  { %v423_v10 = vmul.f32 -1.442695, %v395_v9 }
 0x298   :  { %553 = vpow2.f32 %v423_v10 }
 0x2a2   :  { %v554_v11 = vpop.eup %553 }
 0x2a3   :  { %v399_v12 = vadd.f32 1.0, %v554_v11 }
 0x2a5   :  { %555 = vrcp.f32 %v399_v12 }
 0x2af   :  { %v556_v13 = vpop.eup %555 }
 0x2b0   :  { %403 = vst.msk [vmem:[%s689_s8] sm:$0xff] %vm402_vm4, %v556_v13 }

</bundles_post_ra>
